<compile_context>
chip_gen: v7x
topology: tpu7x:2x2x1
jax: 0.10.0
libtpu: 0.0.40
codegen_flags: <defaults>
</compile_context>

<pallas_src>
import jax
import jax.numpy as jnp
from jax.experimental import pallas as pl
from jax.experimental.pallas import tpu as pltpu


def _round_up(n, m):
    return ((n + m - 1) // m) * m


# ---------------------------------------------------------------------------
# Kernel: one lane-dense MXU matmul + f32 bias add per batch tile.
# ---------------------------------------------------------------------------
def _fused_encoder_kernel(x_ref, w_ref, b_ref, o_ref):
    x = x_ref[...]
    if x.dtype != w_ref.dtype:              # in-kernel operand cast (no extra HBM pass)
        x = x.astype(w_ref.dtype)
    acc = jnp.dot(x, w_ref[...], preferred_element_type=jnp.float32)
    o_ref[...] = (acc + b_ref[...]).astype(o_ref.dtype)   # bias add in f32 (v5e-safe)


# ---------------------------------------------------------------------------
# One-time parameter fusion (do this at setup time, NOT per forward call).
# ---------------------------------------------------------------------------
def fuse_encoder_params(params, *, batches, each_batch_dim,
                        compute_dtype=jnp.float32):
    """Fold  x -> concat_h(x_h @ Wv[h] + bv[h]) @ Wc + bc  into one affine map,
    lane-packed and replicated for the kernel."""
    H, d = batches, each_batch_dim
    D = H * d
    hi = jax.lax.Precision.HIGHEST

    wv_bd = jax.scipy.linalg.block_diag(*[params["wv"][h] for h in range(H)])
    w_eff = jnp.dot(wv_bd, params["wc"], precision=hi)                  # (D, D)
    b_eff = (jnp.dot(params["bv"].reshape(1, D), params["wc"], precision=hi)
             + params["bc"])                                            # (1, D)

    if D < 128 and 128 % D == 0:
        # Pack P batch rows per 128-lane row; replicate W block-diagonally.
        P = 128 // D
        L_in = L_out = P * D
        w_big = jax.scipy.linalg.block_diag(*([w_eff] * P))             # (128, 128)
        b_big = jnp.tile(b_eff, (1, P))
    else:
        # Fallback: keep one row per batch element; zero-pad OUTPUT lanes to a
        # multiple of 128 so stores stay lane-dense (unmasked vst).
        P = 1
        L_in = D
        L_out = _round_up(D, 128)
        w_big = jnp.zeros((L_in, L_out), jnp.float32).at[:, :D].set(w_eff)
        b_big = jnp.zeros((1, L_out), jnp.float32).at[:, :D].set(b_eff)

    return dict(
        w=w_big.astype(compute_dtype),     # bf16 option: v6e/v7x MXU fast path
        b=b_big.astype(jnp.float32),       # bias stays f32 (added after f32 accumulate)
        P=P, L_in=L_in, L_out=L_out, D=D,
    )


def _pick_tile_rows(rows, tb_cap):
    """Largest row tile that divides `rows` exactly (no pad / no output slice),
    is a multiple of 8, preferring an even grid-step count (v7x megacore)."""
    if rows <= tb_cap:
        return rows, rows                       # one step; block == full array
    tb_cap = max(8, (tb_cap // 8) * 8)
    exact = None
    for t in range(tb_cap, 7, -8):
        if rows % t == 0:
            if (rows // t) % 2 == 0:
                return t, rows                  # exact divisor + even step count
            if exact is None:
                exact = t                       # exact divisor, odd step count
    if exact is not None:
        return exact, rows
    return tb_cap, _round_up(rows, tb_cap)      # only path that pads / slices


# ---------------------------------------------------------------------------
# Forward pass.
# ---------------------------------------------------------------------------
def transformer_encoder(x, fused, *, tb=4096, out_dtype=jnp.float32):
    """x: (B, 1, D) with D = batches * each_batch_dim.  Returns (B, 1, D) in out_dtype."""
    B, S, D = x.shape
    if S != 1:
        raise ValueError(
            "Transformer_Encoder only type-checks for seq_len == 1 (it concatenates a "
            f"(B,1,d) zeros block along the last dim); got seq_len={S}.")
    if D != fused["D"]:
        raise ValueError(f"feature dim mismatch: x has D={D}, fused params expect {fused['D']}")

    P, L_in, L_out = fused["P"], fused["L_in"], fused["L_out"]
    w_big, b_big = fused["w"], fused["b"]

    rows = pl.cdiv(B, P)
    x_itemsize = jnp.dtype(x.dtype).itemsize
    o_itemsize = jnp.dtype(out_dtype).itemsize
    w_itemsize = jnp.dtype(w_big.dtype).itemsize

    # Cap the tile so the double-buffered in+out slabs stay under ~24 MiB
    # (safe for v7x's 64 MiB physical VMEM), then pick an exact divisor of rows.
    bytes_per_row = 2 * (L_in * x_itemsize + L_out * o_itemsize)
    vmem_rows_cap = max(8, (int((24 << 20) // bytes_per_row) // 8) * 8)
    tb_rows, rows_padded = _pick_tile_rows(rows, min(tb, vmem_rows_cap))
    B_padded = rows_padded * P

    # Lane-pack the batch.  Common case (B % P == 0, tb_rows | rows): pure
    # reshape — no wrapper-side pad / cast / slice passes over HBM.
    x2 = x.reshape(B, D)
    if B_padded != B:
        x2 = jnp.pad(x2, ((0, B_padded - B), (0, 0)))
    x_packed = x2.reshape(rows_padded, L_in)

    grid_steps = rows_padded // tb_rows
    tile_bytes = 2 * tb_rows * (L_in * x_itemsize + L_out * o_itemsize)
    fixed_bytes = L_in * L_out * w_itemsize + L_out * 4
    vmem_limit = int(min(max(tile_bytes + fixed_bytes + (8 << 20), 24 << 20), 48 << 20))

    cost = pl.CostEstimate(
        flops=2 * rows_padded * L_in * L_out,
        transcendentals=0,
        bytes_accessed=(rows_padded * L_in * x_itemsize     # x read
                        + rows_padded * L_out * o_itemsize  # out write
                        + L_in * L_out * w_itemsize         # resident weight
                        + L_out * 4),                       # resident bias
    )

    out = pl.pallas_call(
        _fused_encoder_kernel,
        out_shape=jax.ShapeDtypeStruct((rows_padded, L_out), out_dtype),
        grid=(grid_steps,),
        in_specs=[
            pl.BlockSpec((tb_rows, L_in), lambda i: (i, 0)),          # x: streamed tiles
            pl.BlockSpec((L_in, L_out), lambda i: (0, 0),             # W_eff: resident,
                         pipeline_mode=pl.Buffered(1)),               # single-buffered
            pl.BlockSpec((1, L_out), lambda i: (0, 0),                # bias: resident
                         pipeline_mode=pl.Buffered(1)),
        ],
        out_specs=pl.BlockSpec((tb_rows, L_out), lambda i: (i, 0)),
        compiler_params=pltpu.CompilerParams(
            dimension_semantics=("parallel",),                        # megacore on v7x
            vmem_limit_bytes=vmem_limit,
        ),
        cost_estimate=cost,
    )(x_packed, w_big, b_big)

    if P > 1:
        out = out.reshape(B_padded, D)
    elif L_out != D:
        out = out[:, :D]                       # only in the padded-lane fallback
    if B_padded != B:
        out = out[:B]                          # only in the padded-batch fallback
    return out.reshape(B, 1, D)


# ---------------------------------------------------------------------------
# Parameter init + pure-JAX reference of the full PyTorch forward.
# ---------------------------------------------------------------------------
def init_params(key, *, batches, each_batch_dim):
    """Deterministic init mimicking nn.Linear's U(-1/sqrt(in), 1/sqrt(in))."""
    d = each_batch_dim
    D = batches * d
    ks = jax.random.split(key, 8)
    bd, bD = 1.0 / (d ** 0.5), 1.0 / (D ** 0.5)
    u = lambda k, shape, b: jax.random.uniform(k, shape, jnp.float32, -b, b)
    return dict(
        # per-head Linear(d, d), stored pre-transposed: y = x @ w[h] + b[h]
        wq=u(ks[0], (batches, d, d), bd), bq=u(ks[1], (batches, 1, d), bd),
        wk=u(ks[2], (batches, d, d), bd), bk=u(ks[3], (batches, 1, d), bd),
        wv=u(ks[4], (batches, d, d), bd), bv=u(ks[5], (batches, 1, d), bd),
        # combine_head_and_change_dim: Linear(D, D), stored pre-transposed
        wc=u(ks[6], (D, D), bD), bc=u(ks[7], (1, D), bD),
    )


def reference(x, params, *, batches, each_batch_dim):
    """Pure-JAX replica of the full PyTorch forward (q/k/softmax included)."""
    d = each_batch_dim
    d_k = float(d) ** -0.5
    hi = jax.lax.Precision.HIGHEST
    outs = []
    for h in range(batches):
        xh = x[:, :, h * d:(h + 1) * d]
        q = jnp.einsum("bsi,io->bso", xh, params["wq"][h], precision=hi) + params["bq"][h]
        k = jnp.einsum("bsi,io->bso", xh, params["wk"][h], precision=hi) + params["bk"][h]
        v = jnp.einsum("bsi,io->bso", xh, params["wv"][h], precision=hi) + params["bv"][h]
        s = jnp.einsum("bqd,bkd->bqk", q, k, precision=hi) * d_k
        p = jax.nn.softmax(s, axis=-1)
        outs.append(jnp.einsum("bqk,bkd->bqd", p, v, precision=hi))
    cat = jnp.concatenate(outs, axis=-1)
    return jnp.einsum("bsi,io->bso", cat, params["wc"], precision=hi) + params["bc"]


if __name__ == "__main__":
    # Small shapes consistent with the module: seq len must be 1.
    B = 64
    batches = 4                                  # number of heads
    each_batch_dim = 8
    input_data_dim = batches * each_batch_dim    # 32
    # feed_forward_hidden_dim is unused in the module's forward pass.

    key = jax.random.PRNGKey(0)
    k_x, k_p = jax.random.split(key)
    x = jax.random.normal(k_x, (B, 1, input_data_dim), dtype=jnp.float32)
    params = init_params(k_p, batches=batches, each_batch_dim=each_batch_dim)

    ref = reference(x, params, batches=batches, each_batch_dim=each_batch_dim)

    # --- f32 path: small tile so the pipelined grid has 2 (even) steps. -----
    fused_f32 = fuse_encoder_params(params, batches=batches,
                                    each_batch_dim=each_batch_dim)
    enc_f32 = jax.jit(lambda xx: transformer_encoder(xx, fused_f32, tb=8))
    out = jax.block_until_ready(enc_f32(x))
    assert out.shape == (B, 1, input_data_dim)
    assert jnp.allclose(out, ref, atol=1e-4, rtol=1e-4)

    # --- bf16 end-to-end path (bf16 x produced upstream, bf16 W, bf16 out):
    #     halves HBM traffic; accumulation and bias add stay f32. ------------
    fused_bf16 = fuse_encoder_params(params, batches=batches,
                                     each_batch_dim=each_batch_dim,
                                     compute_dtype=jnp.bfloat16)
    out_bf16 = transformer_encoder(x.astype(jnp.bfloat16), fused_bf16,
                                   out_dtype=jnp.bfloat16)
    out_bf16 = jax.block_until_ready(out_bf16)
    assert out_bf16.dtype == jnp.bfloat16
    assert jnp.allclose(out_bf16.astype(jnp.float32), ref, atol=5e-2, rtol=5e-2)

    # --- mixed path: f32 x, bf16 weights -> operand cast happens IN-KERNEL
    #     (no extra wrapper-side HBM pass). ----------------------------------
    out_mixed = jax.block_until_ready(transformer_encoder(x, fused_bf16))
    assert jnp.allclose(out_mixed, ref, atol=5e-2, rtol=5e-2)

    print("KERNEL_OK")
</pallas_src>

<mosaic_0001>
module attributes {stable_mosaic.version = 11 : i64} {
  func.func @_fused_encoder_kernel(%arg0: i32, %arg1: memref<8x128xf32, #tpu.memory_space<vmem>>, %arg2: memref<128x128xf32, #tpu.memory_space<vmem>>, %arg3: memref<1x128xf32, #tpu.memory_space<vmem>>, %arg4: memref<8x128xf32, #tpu.memory_space<vmem>>) attributes {dimension_semantics = [#tpu.dimension_semantics<parallel>], iteration_bounds = array<i64: 2>, scalar_prefetch = 0 : i64, scratch_operands = 0 : i64, tpu.core_type = #tpu.core_type<tc>, window_params = [{transform_indices = @transform_0, window_bounds = array<i64: 8, 128>}, {pipeline_mode = #tpu.pipeline_mode<synchronous>, transform_indices = @transform_1, window_bounds = array<i64: 128, 128>}, {pipeline_mode = #tpu.pipeline_mode<synchronous>, transform_indices = @transform_2, window_bounds = array<i64: 1, 128>}, {transform_indices = @transform_3, window_bounds = array<i64: 8, 128>}]} {
    %c0 = arith.constant 0 : index
    %c0_0 = arith.constant 0 : index
    %0 = vector.load %arg1[%c0, %c0_0] : memref<8x128xf32, #tpu.memory_space<vmem>>, vector<8x128xf32>
    %c0_1 = arith.constant 0 : index
    %c0_2 = arith.constant 0 : index
    %1 = vector.load %arg2[%c0_1, %c0_2] : memref<128x128xf32, #tpu.memory_space<vmem>>, vector<128x128xf32>
    %cst = arith.constant dense<0.000000e+00> : vector<8x128xf32>
    %2 = tpu.matmul %0, %1, %cst {dimension_numbers = #tpu.dot_dimension_numbers<[1], [0], [0], [1], [0, 0, 1, 1], [], []>} : vector<8x128xf32>, vector<128x128xf32>, vector<8x128xf32> -> vector<8x128xf32>
    %c0_3 = arith.constant 0 : index
    %c0_4 = arith.constant 0 : index
    %3 = vector.load %arg3[%c0_3, %c0_4] : memref<1x128xf32, #tpu.memory_space<vmem>>, vector<1x128xf32>
    %4 = vector.broadcast %3 : vector<1x128xf32> to vector<8x128xf32>
    %5 = arith.addf %2, %4 : vector<8x128xf32>
    %c0_5 = arith.constant 0 : index
    %c0_6 = arith.constant 0 : index
    %6 = vector.load %arg4[%c0_5, %c0_6] : memref<8x128xf32, #tpu.memory_space<vmem>>, vector<8x128xf32>
    tpu.vector_store %arg4[%c0_5, %c0_6], %5 {strides = array<i32>} : memref<8x128xf32, #tpu.memory_space<vmem>>, vector<8x128xf32>,
    return
  }
  func.func @transform_0(%arg0: i32) -> (i32, i32) {
    %c0_i32 = arith.constant 0 : i32
    %c0_i32_0 = arith.constant 0 : i32
    return %arg0, %c0_i32 : i32, i32
  }
  func.func @transform_1(%arg0: i32) -> (i32, i32) {
    %c0_i32 = arith.constant 0 : i32
    %c0_i32_0 = arith.constant 0 : i32
    %c0_i32_1 = arith.constant 0 : i32
    return %c0_i32, %c0_i32_0 : i32, i32
  }
  func.func @transform_2(%arg0: i32) -> (i32, i32) {
    %c0_i32 = arith.constant 0 : i32
    %c0_i32_0 = arith.constant 0 : i32
    %c0_i32_1 = arith.constant 0 : i32
    return %c0_i32, %c0_i32_0 : i32, i32
  }
  func.func @transform_3(%arg0: i32) -> (i32, i32) {
    %c0_i32 = arith.constant 0 : i32
    %c0_i32_0 = arith.constant 0 : i32
    return %arg0, %c0_i32 : i32, i32
  }
}

</mosaic_0001>

<bundles_post_ra>
// kernel: _lambda_.1
= control target key start
LH: loop header
LB: loop body
LE: loop exit
PB: predicated region body
PF: predicated region fallthrough
CT: control target
= control target key end

     0   :  { %s442_s12 = smov 0   ;;  %s514_s0 = inlined_call_operand.vmem [shape: f32[16,128], index: 0, kind: input, shape index: {}]   ;;  %s515_s1 = inlined_call_operand.vmem [shape: f32[128,128], index: 1, kind: input, shape index: {}]   ;;  %s516_s2 = inlined_call_operand.vmem [shape: f32[1,128], index: 2, kind: input, shape index: {}]   ;;  %s517_s3 = inlined_call_operand.vmem [shape: f32[16,128], index: 3, kind: output, shape index: {}]  }
   0x1 LB: > { %s314_s13 = sadd.s32 4294967295, %s417_s12   ;;  %p318_p0 = scmp.ge.s32.totalorder %s417_s12, 1  ;;  %s417_s12 = sphi %s442_s12, %s13_s12  }
   0x2   : > { %p136_p1 = scmp.lt.s32.totalorder %s417_s12, 3 }
   0x4   : > { %p137_p2 = pnand %p318_p0, %p136_p1 }
   0x5   : > { %v167_v0 = vld [vmem:[%s515_s1] sm:$0xff] (!%p137_p2)  ;;  %v168_v1 = vld [vmem:[%s515_s1 + $0x8] sm:$0xff] (!%p137_p2)  ;;  %v169_v2 = vld [vmem:[%s515_s1 + $0x10] sm:$0xff] (!%p137_p2)  ;;  %v419_v3 = vmov (!%p137_p2), 0.0|0.0   ;;  %vm420_vm0 = vmmov (!%p137_p2), 0   ;;  %v421_v6 = vmov (!%p137_p2), 0.0  }
   0x6   : > { %140 = sbr.rel (%p137_p2) target bundleno = 254 (0xfe), region = 32  ;;  %376 = vmatprep.subr.bf16.mxu0 (!%p137_p2), %v419_v3  ;;  %v377_v4 = vpack.c.bf16 (!%p137_p2), %v168_v1, %v167_v0  ;;  %v170_v5 = vld [vmem:[%s515_s1 + $0x18] sm:$0xff] (!%p137_p2)  ;;  %373 = vmatprep.mubr.msk.f32.mxu0 (!%p137_p2), %vm420_vm0, %v421_v6  ;;  %v171_v8 = vld [vmem:[%s515_s1 + $0x20] sm:$0xff] (!%p137_p2)  ;;  %v172_v9 = vld [vmem:[%s515_s1 + $0x28] sm:$0xff] (!%p137_p2)  ;;  %p158_p3 = scmp.lt.s32.totalorder (!%p137_p2), %s314_s13, 1 }
   0x7   : > { %v380_v7 = vpack.c.bf16 (!%p137_p2), %v170_v5, %v169_v2  ;;  %v383_v10 = vpack.c.bf16 (!%p137_p2), %v172_v9, %v171_v8  ;;  %v173_v11 = vld [vmem:[%s515_s1 + $0x30] sm:$0xff] (!%p137_p2)  ;;  %v174_v12 = vld [vmem:[%s515_s1 + $0x38] sm:$0xff] (!%p137_p2)  ;;  %v175_v14 = vld [vmem:[%s515_s1 + $0x40] sm:$0xff] (!%p137_p2) }
   0x8   : > { %378 = vmatpush3.bf16.msra.mxu0 (!%p137_p2), %v377_v4  ;;  %v386_v13 = vpack.c.bf16 (!%p137_p2), %v174_v12, %v173_v11  ;;  %v176_v15 = vld [vmem:[%s515_s1 + $0x48] sm:$0xff] (!%p137_p2)  ;;  %v177_v17 = vld [vmem:[%s515_s1 + $0x50] sm:$0xff] (!%p137_p2)  ;;  %v178_v18 = vld [vmem:[%s515_s1 + $0x58] sm:$0xff] (!%p137_p2) }
   0x9   : > { %379 = vmatprep.subr.bf16.mxu0 (!%p137_p2), %v419_v3  ;;  %v389_v16 = vpack.c.bf16 (!%p137_p2), %v176_v15, %v175_v14  ;;  %v392_v19 = vpack.c.bf16 (!%p137_p2), %v178_v18, %v177_v17  ;;  %v179_v20 = vld [vmem:[%s515_s1 + $0x60] sm:$0xff] (!%p137_p2)  ;;  %v180_v21 = vld [vmem:[%s515_s1 + $0x68] sm:$0xff] (!%p137_p2)  ;;  %v181_v23 = vld [vmem:[%s515_s1 + $0x70] sm:$0xff] (!%p137_p2) }
   0xa   : > { %v395_v22 = vpack.c.bf16 (!%p137_p2), %v180_v21, %v179_v20  ;;  %v182_v24 = vld [vmem:[%s515_s1 + $0x78] sm:$0xff] (!%p137_p2)  ;;  %v321_v27 = vld [vmem:[%s516_s2] ss:$0 sm:$0xff] (!%p137_p2) }
   0xb   : > { %v398_v25 = vpack.c.bf16 (!%p137_p2), %v182_v24, %v181_v23 }
   0xc   : > { %381 = vmatpush3.bf16.msra.mxu0 (!%p137_p2), %v380_v7 }
   0xd   : > { %382 = vmatprep.subr.bf16.mxu0 %v419_v3  ;;  %s519_s13 = smov (!%p158_p3, %s314_s13), 1 }
   0xe   : > { %s319_s21 = sshll.u32 %s519_s13, 3 }
   0xf   : > { %s161_s24 = scalar_lea.vmem %s514_s0, %s319_s21  ;;  %s165_s29 = scalar_lea.vmem %s517_s3, %s319_s21 }
  0x10   : > { %384 = vmatpush3.bf16.msra.mxu0 %v383_v10  ;;  %v166_v26 = vld [vmem:[%s161_s24] sm:$0xff] }
  0x11   : > { %385 = vmatprep.subr.bf16.mxu0 %v419_v3 }
  0x14   : > { %387 = vmatpush3.bf16.msra.mxu0 %v386_v13 }
  0x15   : > { %388 = vmatprep.subr.bf16.mxu0 %v419_v3 }
  0x18   : > { %390 = vmatpush3.bf16.msra.mxu0 %v389_v16 }
  0x19   : > { %391 = vmatprep.subr.bf16.mxu0 %v419_v3 }
  0x1c   : > { %393 = vmatpush3.bf16.msra.mxu0 %v392_v19 }
  0x1d   : > { %394 = vmatprep.subr.bf16.mxu0 %v419_v3 }
  0x20   : > { %396 = vmatpush3.bf16.msra.mxu0 %v395_v22 }
  0x21   : > { %397 = vmatprep.subr.bf16.mxu0 %v419_v3 }
  0x24   : > { %399 = vmatpush3.bf16.msra.mxu0 %v398_v25 }
  0x27   : > { %374 = vmatmul.mubr.f32.vlgmr.msra.gmra.mrb[0].mxu0 %v166_v26 }
  0xfa   : > { %v256_v28 = vpop.f32.mrb[0].mxu0 }
  0xfb   : > { %v257_v29 = vadd.f32 %v321_v27, %v256_v28  ;;  %v375_v30 = vpop.f32.mrb[1].mxu0 }
  0xfd   : > { %260 = vst [vmem:[%s165_s29] sm:$0xff] %v257_v29 }
  0xfe PF: > { %s13_s12 = sadd.s32 1, %s417_s12  }
  0xff   : > { %p10_p4 = scmp.ge.s32.totalorder %s13_s12, 4  }
 0x101   :  { %12 = sbr.rel (!%p10_p4) target bundleno = 1 (0x1), region = 62 }

</bundles_post_ra>
